<compile_context>
chip_gen: v7x
topology: tpu7x:2x2x1
jax: 0.10.0
libtpu: 0.0.40
codegen_flags: <defaults>
</compile_context>

<pallas_src>
import jax
import jax.numpy as jnp
from jax.experimental import pallas as pl
from jax.experimental.pallas import tpu as pltpu


_ROW_TILE = 256    # sublane-axis tile (multiple of 8)
_LANE_TILE = 2048  # lane-axis tile (multiple of 128) -> 2 MiB per f32 tile


def _gate_scale_kernel(w_ref, x_ref, o_ref):
    # w_ref: (TR, 1)   raw (pre-sigmoid) per-row weights, row = flattened (n, c)
    # x_ref: (TR, THW) input tile
    # o_ref: (TR, THW) output tile
    gate = jax.nn.sigmoid(w_ref[...].astype(jnp.float32)).astype(x_ref.dtype)
    o_ref[...] = x_ref[...] * gate           # broadcast (TR,1) over lanes, VPU


def attention_module(x_nchw, weight):
    """y = sigmoid(weight) * x. weight: (1, C, 1, 1); x: (N, C, H, W)."""
    N, C, H, W = x_nchw.shape
    R, HW = N * C, H * W

    # Lane-dense 2D view: (N*C, H*W).
    x2d = x_nchw.reshape(R, HW)
    # Per-row raw weight column (only N*C scalars); sigmoid applied in-kernel.
    w_rows = jnp.tile(weight.reshape(1, C), (N, 1)).reshape(R, 1).astype(jnp.float32)

    # Tile sizes: multiples of (8, 128), or fall back to the full extent when
    # the dim is not aligned (always correct; Pallas handles partial edge blocks).
    tr = min(R, _ROW_TILE) if R % 8 == 0 else R
    thw = min(HW, _LANE_TILE) if HW % 128 == 0 else HW

    grid = (pl.cdiv(R, tr), pl.cdiv(HW, thw))

    out = pl.pallas_call(
        _gate_scale_kernel,
        out_shape=jax.ShapeDtypeStruct((R, HW), x2d.dtype),
        grid_spec=pltpu.PrefetchScalarGridSpec(
            num_scalar_prefetch=0,
            grid=grid,
            in_specs=[
                pl.BlockSpec((tr, 1), lambda i, j: (i, 0)),     # weight column
                pl.BlockSpec((tr, thw), lambda i, j: (i, j)),   # x tile
            ],
            out_specs=pl.BlockSpec((tr, thw), lambda i, j: (i, j)),
        ),
        compiler_params=pltpu.CompilerParams(
            dimension_semantics=("parallel", "parallel"),
        ),
    )(w_rows, x2d)

    return out.reshape(N, C, H, W)


if __name__ == "__main__":
    key = jax.random.PRNGKey(0)
    k_w, k_x = jax.random.split(key)

    N, C, H, W = 2, 4, 16, 16

    # Deterministic init mirroring: torch.rand(1, C, 1, 1) + 10
    weight = jax.random.uniform(k_w, (1, C, 1, 1), dtype=jnp.float32) + 10.0
    x = jax.random.normal(k_x, (N, C, H, W), dtype=jnp.float32)

    y = attention_module(x, weight)
    y = jax.block_until_ready(y)

    # Reference check in plain JAX
    ref = jax.nn.sigmoid(weight) * x
    assert y.shape == (N, C, H, W)
    assert jnp.allclose(y, ref, atol=1e-6, rtol=1e-6), "mismatch vs reference"

    print("KERNEL_OK")
</pallas_src>

<mosaic_0001>
module attributes {stable_mosaic.version = 11 : i64} {
  func.func @_gate_scale_kernel(%arg0: i32, %arg1: i32, %arg2: memref<8x1xf32, #tpu.memory_space<vmem>>, %arg3: memref<8x256xf32, #tpu.memory_space<vmem>>, %arg4: memref<8x256xf32, #tpu.memory_space<vmem>>) attributes {dimension_semantics = [#tpu.dimension_semantics<parallel>, #tpu.dimension_semantics<parallel>], iteration_bounds = array<i64: 1, 1>, scalar_prefetch = 0 : i64, scratch_operands = 0 : i64, tpu.core_type = #tpu.core_type<tc>, window_params = [{transform_indices = @transform_0, window_bounds = array<i64: 8, 1>}, {transform_indices = @transform_1, window_bounds = array<i64: 8, 256>}, {transform_indices = @transform_2, window_bounds = array<i64: 8, 256>}]} {
    %c0 = arith.constant 0 : index
    %c0_0 = arith.constant 0 : index
    %0 = vector.load %arg2[%c0, %c0_0] : memref<8x1xf32, #tpu.memory_space<vmem>>, vector<8x1xf32>
    %1 = arith.negf %0 : vector<8x1xf32>
    %2 = math.exp %1 : vector<8x1xf32>
    %cst = arith.constant 1.000000e+00 : f32
    %3 = vector.broadcast %cst : f32 to vector<8x1xf32>
    %4 = arith.addf %3, %2 : vector<8x1xf32>
    %5 = arith.divf %3, %4 : vector<8x1xf32>
    %c0_1 = arith.constant 0 : index
    %c0_2 = arith.constant 0 : index
    %6 = vector.load %arg3[%c0_1, %c0_2] : memref<8x256xf32, #tpu.memory_space<vmem>>, vector<8x256xf32>
    %7 = vector.broadcast %5 : vector<8x1xf32> to vector<8x256xf32>
    %8 = arith.mulf %6, %7 : vector<8x256xf32>
    %c0_3 = arith.constant 0 : index
    %c0_4 = arith.constant 0 : index
    %9 = vector.load %arg4[%c0_3, %c0_4] : memref<8x256xf32, #tpu.memory_space<vmem>>, vector<8x256xf32>
    tpu.vector_store %arg4[%c0_3, %c0_4], %8 {strides = array<i32>} : memref<8x256xf32, #tpu.memory_space<vmem>>, vector<8x256xf32>,
    return
  }
  func.func @transform_0(%arg0: i32, %arg1: i32) -> (i32, i32) {
    %c0_i32 = arith.constant 0 : i32
    %c0_i32_0 = arith.constant 0 : i32
    return %arg0, %c0_i32 : i32, i32
  }
  func.func @transform_1(%arg0: i32, %arg1: i32) -> (i32, i32) {
    %c0_i32 = arith.constant 0 : i32
    return %arg0, %arg1 : i32, i32
  }
  func.func @transform_2(%arg0: i32, %arg1: i32) -> (i32, i32) {
    %c0_i32 = arith.constant 0 : i32
    return %arg0, %arg1 : i32, i32
  }
}

</mosaic_0001>

<bundles_post_ra>
// kernel: tpu_custom_call.1
= control target key start
LH: loop header
LB: loop body
LE: loop exit
PB: predicated region body
PF: predicated region fallthrough
CT: control target
= control target key end

     0   :  { %7 = vsyncpa [#allocation3], 0  ;;  %s159_s0 = inlined_call_operand.vmem [shape: f32[8,1], index: 0, kind: input, shape index: {}]   ;;  %s160_s1 = inlined_call_operand.hbm [shape: f32[8,256], index: 1, kind: input, shape index: {}]   ;;  %s161_s2 = inlined_call_operand.hbm [shape: f32[8,256], index: 2, kind: output, shape index: {}]  }
   0x1   :  { %8 = vsyncpa [#allocation4], 0  ;;  %s114_s9 = smov [#allocation2]   ;;  %s66_s13 = scalar_lea.hbm %s160_s1, 256 }
   0x2   :  { %s17_s10 = sshll.u32 %s114_s9, 4  ;;  %p67_p0 = scmp.ne.s32.totalorder %s160_s1, %s66_s13  ;;  %s18_s10 = int_to_ptr.vmem [resolvable:$true] %s17_s10 }
   0x3   :  { %p70_p1 = scmp.lt.u32.totalorder %s66_s13, %s160_s1 }
   0x5   :  { %p72_p2 = pnand %p70_p1, %p67_p0 }
   0x7   :  { %75 = shalt.err (!%p72_p2)
}
   0x8   :  { %s76_s18 = scalar_lea.vmem %s18_s10, 256  ;;  %p81_p4 = scmp.lt.s32.totalorder %s18_s10, %s18_s10 }
   0x9   :  { %p77_p3 = scmp.ne.s32.totalorder %s18_s10, %s76_s18  ;;  %p82_p5 = scmp.lt.s32.totalorder %s76_s18, %s76_s18 }
   0xb   :  { %p83_p6 = por %p82_p5, %p81_p4 }
   0xd   :  { %p84_p7 = pnand %p83_p6, %p77_p3 }
   0xf   :  { %87 = shalt.err (!%p84_p7)
}
  0x10   :  { %20 = dma.hbm_to_vmem [thread:$0]  %s160_s1, 256, %s18_s10, [#allocation3]  }
  0x11   :  { %110 = dma.done.wait [#allocation3], 256  }
  0x12   :  { %111 = vsyncadd [#allocation3], 4294967040  ;;  %v115_v0 = vmov 0   ;;  %v24_v1 = vld [vmem:[%s159_s0] sm:$0xff]  ;;  %v32_v7 = vld [vmem:[#allocation2 + $0x8] sm:$0xff]  ;;  %s116_s23 = smov [#allocation5]  }
  0x13   :  { %61 = vset.pattern.permute.xlu0 %v115_v0  ;;  %v57_v2 = vmul.f32 -1.442695, %v24_v1  ;;  %v31_v6 = vld [vmem:[#allocation2] sm:$0xff]  ;;  %s48_s24 = sshll.u32 %s116_s23, 4  ;;  %s49_s24 = int_to_ptr.vmem [resolvable:$true] %s48_s24 }
  0x14   :  { %s88_s1 = scalar_lea.vmem %s49_s24, 256  ;;  %p93_p9 = scmp.lt.s32.totalorder %s49_s24, %s49_s24 }
  0x15   :  { %62 = vpow2.f32 %v57_v2  ;;  %p89_p8 = scmp.ne.s32.totalorder %s49_s24, %s88_s1  ;;  %p94_p10 = scmp.lt.s32.totalorder %s88_s1, %s88_s1 }
  0x17   :  { %p95_p11 = por %p94_p10, %p93_p9 }
  0x19   :  { %p96_p12 = pnand %p95_p11, %p89_p8 }
  0x1f   :  { %v63_v3 = vpop.eup %62 }
  0x20   :  { %v28_v4 = vadd.f32 1.0, %v63_v3 }
  0x22   :  { %64 = vrcp.f32 %v28_v4 }
  0x2c   :  { %v65_v5 = vpop.eup %64 }
  0x2d   :  { %35 = vperm.xlu0 %61, %v65_v5  }
  0xac   :  { %v36_v8 = vpop.permute.xlu0 %35 }
  0xad   :  { %v38_v9 = vmul.f32 %v36_v8, %v31_v6  ;;  %v39_v10 = vmul.f32 %v36_v8, %v32_v7 }
  0xaf   :  { %40 = vst [vmem:[#allocation5] sm:$0xff] %v38_v9  ;;  %41 = vst [vmem:[#allocation5 + $0x8] sm:$0xff] %v39_v10 }
  0xb0   :  { %99 = shalt.err (!%p96_p12)
}
  0xb1   :  { %s100_s26 = scalar_lea.hbm %s161_s2, 256 }
  0xb2   :  { %p101_p13 = scmp.ne.s32.totalorder %s161_s2, %s100_s26  ;;  %p104_p0 = scmp.lt.u32.totalorder %s100_s26, %s161_s2 }
  0xb4   :  { %p106_p1 = pnand %p104_p0, %p101_p13 }
  0xb6   :  { %109 = shalt.err (!%p106_p1)
}
  0xb7   :  { %51 = dma.vmem_to_hbm [thread:$0]  %s49_s24, 256, %s161_s2, [#allocation4]  }
  0xb8   :  { %112 = dma.done.wait [#allocation4], 256  }
  0xb9   :  { %113 = vsyncadd [#allocation4], 4294967040 }
  0xba   :  { %55 = vsyncpa [#allocation3], 1 }
  0xbb   :  { %56 = vsyncpa [#allocation4], 1 }

</bundles_post_ra>
